<compile_context>
chip_gen: v6e
topology: v6e:2x2x1
jax: 0.10.0
libtpu: 0.0.40
codegen_flags: <defaults>
</compile_context>

<pallas_src>
import functools

import jax
import jax.numpy as jnp
from jax.experimental import pallas as pl
from jax.experimental.pallas import tpu as pltpu


# ----------------------------- Pallas kernel ------------------------------ #
def pianet_kernel(t_ref, x_ref, win_ref, w_ref, wf_ref, out_ref, xaug_ref,
                  *, n_layers, hidden, num_classes):
    H = hidden
    L = n_layers
    C = num_classes
    N = t_ref.shape[0]
    D1 = x_ref.shape[1] + 1                       # input_dim + time

    # --- assemble X = [t | x] in VMEM (no wrapper concat / HBM round-trip) ---
    xaug_ref[:, 0:1] = t_ref[...]
    xaug_ref[:, 1:D1] = x_ref[...]

    # MinMaxScaler().fit_transform(X): per-column (X - min) / (max - min),
    # zero-range columns divided by 1 (sklearn behavior).
    X = xaug_ref[:, 0:D1]                         # (N, D1)
    xmin = jnp.min(X, axis=0, keepdims=True)
    xmax = jnp.max(X, axis=0, keepdims=True)
    rng = xmax - xmin
    rng = jnp.where(rng == 0.0, 1.0, rng)
    inv = pl.reciprocal(rng)                      # exact reciprocal (EUP path)
    Xs = (X - xmin) * inv

    # Write scaled X back + a ones column -> biases fold into the fused matmul.
    xaug_ref[:, 0:D1] = Xs
    xaug_ref[:, D1:D1 + 1] = jnp.ones((N, 1), jnp.float32)

    # --- single fused loop-invariant matmul -----------------------------------
    # Columns: [layer0 gates h|z|g|r, layer1 gates h|z|g|r, ..., W0 block].
    # Last row of win_ref is the packed bias row (picked up by the ones column).
    A = jnp.dot(xaug_ref[...], win_ref[...],
                preferred_element_type=jnp.float32)          # (N, L*4H + H)

    # Initial DenseLayer with tanh (slice starts on a vreg boundary for H=32).
    S = jnp.tanh(A[:, L * 4 * H:])

    # --- DGM LSTM-style layers (n_layers static -> unrolled) ------------------
    for l in range(L):
        base = l * 4 * H
        P = A[:, base:base + 4 * H]               # (N, 4H), gates [h, z, g, r]
        Wl = w_ref[l]                             # (H, 4H) = [Wh|Wz|Wg|Wr]

        # One lane-dense recurrent matmul for all four gate columns; the 'h'
        # column here (computed with plain S) is discarded and recomputed below
        # with S*R, as the DGM recurrence requires.
        T = jnp.tanh(jnp.dot(S, Wl, preferred_element_type=jnp.float32) + P)
        Z = T[:, 1 * H:2 * H]
        G = T[:, 2 * H:3 * H]
        R = T[:, 3 * H:4 * H]

        # h gate lives at lane offset 0 of both Wl and P -> no lane rotates.
        Hg = jnp.tanh(
            jnp.dot(S * R, Wl[:, :H], preferred_element_type=jnp.float32)
            + P[:, :H]
        )
        S = (1.0 - G) * Hg + Z * S

    # --- final DenseLayer (identity); bf is the last (sublane-aligned) row ----
    Wf = wf_ref[...]                              # (H+1, C)
    result = (jnp.dot(S, Wf[:H, :], preferred_element_type=jnp.float32)
              + Wf[H:H + 1, :])

    # Packed output: [result | op] in one buffer (one output DMA).
    out_ref[:, 0:C] = result

    # torch.argmax(result, 1) -> first index of max, as float.
    col = jax.lax.broadcasted_iota(jnp.int32, result.shape, 1)
    maxv = jnp.max(result, axis=1, keepdims=True)
    idx = jnp.min(jnp.where(result == maxv, col, C), axis=1, keepdims=True)
    out_ref[:, C:C + 1] = idx.astype(jnp.float32)


# ------------------------------- wrapper ----------------------------------- #
def pianet_forward(t, x, params, *, n_layers, layer_width):
    """Run PIANet forward. Returns (op, result) like the PyTorch module."""
    N = t.shape[0]
    H = layer_width
    L = n_layers
    d1 = x.shape[1] + 1
    C = params["Wf_aug"].shape[1]
    total = L * 4 * H + H

    kernel = functools.partial(pianet_kernel, n_layers=L, hidden=H, num_classes=C)
    vmem = pl.BlockSpec(memory_space=pltpu.MemorySpace.VMEM)

    flops = (2 * N * (d1 + 1) * total                    # fused input-side matmul
             + L * (2 * N * H * 4 * H + 2 * N * H * H)   # recurrent matmuls
             + 2 * N * (H + 1) * C)                      # final dense
    transcendentals = N * (H + L * 5 * H)                # tanh count
    bytes_accessed = 4 * (N * 1 + N * (d1 - 1)
                          + (d1 + 1) * total
                          + L * H * 4 * H
                          + (H + 1) * C
                          + N * (C + 1))

    out = pl.pallas_call(
        kernel,
        out_shape=jax.ShapeDtypeStruct((N, C + 1), jnp.float32),
        in_specs=[vmem] * 5,
        out_specs=vmem,
        scratch_shapes=[pltpu.VMEM((N, d1 + 1), jnp.float32)],
        cost_estimate=pl.CostEstimate(flops=flops,
                                      transcendentals=transcendentals,
                                      bytes_accessed=bytes_accessed),
    )(t.astype(jnp.float32), x.astype(jnp.float32),
      params["W_in_aug"], params["W_all"], params["Wf_aug"])

    result = out[:, :C]
    op = out[:, C:C + 1]
    return op, result


# --------------------------- parameter init -------------------------------- #
def xavier_normal(key, shape):
    fan_in, fan_out = shape[0], shape[1]
    std = jnp.sqrt(2.0 / (fan_in + fan_out))
    return jax.random.normal(key, shape, dtype=jnp.float32) * std


def init_params(key, layer_width, n_layers, input_dim, num_classes):
    d1 = input_dim + 1  # +1 for time
    H = layer_width
    keys = jax.random.split(key, 2 + 8 * n_layers)
    k_iter = iter(keys)

    # initial DenseLayer(layer_width, d1)
    W0 = xavier_normal(next(k_iter), (d1, H))
    b0 = jnp.zeros((1, H), jnp.float32)

    # LSTM layers, packed lane-dense with gate order [h, z, g, r]:
    #   U_all cols: layer-major blocks of [Uh|Uz|Ug|Ur]          (d1, L*4H)
    #   W_all     : per layer [Wh|Wz|Wg|Wr]                      (L, H, 4H)
    u_cols, w_layers = [], []
    for _ in range(n_layers):
        Uz = xavier_normal(next(k_iter), (d1, H))
        Ug = xavier_normal(next(k_iter), (d1, H))
        Ur = xavier_normal(next(k_iter), (d1, H))
        Uh = xavier_normal(next(k_iter), (d1, H))
        Wz = xavier_normal(next(k_iter), (H, H))
        Wg = xavier_normal(next(k_iter), (H, H))
        Wr = xavier_normal(next(k_iter), (H, H))
        Wh = xavier_normal(next(k_iter), (H, H))
        u_cols.append(jnp.concatenate([Uh, Uz, Ug, Ur], axis=1))   # (d1, 4H)
        w_layers.append(jnp.concatenate([Wh, Wz, Wg, Wr], axis=1)) # (H, 4H)
    U_all = jnp.concatenate(u_cols, axis=1)                        # (d1, L*4H)
    W_all = jnp.stack(w_layers, axis=0)                            # (L, H, 4H)
    b_all = jnp.zeros((1, n_layers * 4 * H), jnp.float32)

    # Fused input-side slab: [U_all | W0] with the packed bias row appended
    # (biases are zeros at init, kept general).
    W_in = jnp.concatenate([U_all, W0], axis=1)                    # (d1, L*4H + H)
    b_in = jnp.concatenate([b_all, b0], axis=1)                    # (1,  L*4H + H)
    W_in_aug = jnp.concatenate([W_in, b_in], axis=0)               # (d1+1, L*4H+H)

    # final DenseLayer(num_classes, layer_width), identity activation; bf folded
    # as the last row of Wf_aug.
    Wf = xavier_normal(jax.random.fold_in(key, 123), (H, num_classes))
    bf = jnp.zeros((1, num_classes), jnp.float32)
    Wf_aug = jnp.concatenate([Wf, bf], axis=0)                     # (H+1, C)

    return {"W_in_aug": W_in_aug, "W_all": W_all, "Wf_aug": Wf_aug}


# ---------------------------- reference (JAX) ------------------------------ #
def pianet_ref(t, x, params, *, n_layers, layer_width):
    H = layer_width
    L = n_layers
    X = jnp.concatenate([t, x], axis=1).astype(jnp.float32)
    d1 = X.shape[1]
    Win = params["W_in_aug"]

    xmin = jnp.min(X, axis=0, keepdims=True)
    xmax = jnp.max(X, axis=0, keepdims=True)
    rng = jnp.where(xmax - xmin == 0.0, 1.0, xmax - xmin)
    Xs = (X - xmin) / rng

    W0 = Win[:d1, L * 4 * H:]
    b0 = Win[d1:, L * 4 * H:]
    S = jnp.tanh(Xs @ W0 + b0)
    for l in range(L):
        base = l * 4 * H
        Ul = Win[:d1, base:base + 4 * H]
        bl = Win[d1:, base:base + 4 * H]
        Wl = params["W_all"][l]
        Uh, Uz, Ug, Ur = (Ul[:, i * H:(i + 1) * H] for i in range(4))
        Wh, Wz, Wg, Wr = (Wl[:, i * H:(i + 1) * H] for i in range(4))
        bh, bz, bg, br = (bl[:, i * H:(i + 1) * H] for i in range(4))
        Z = jnp.tanh(Xs @ Uz + S @ Wz + bz)
        G = jnp.tanh(Xs @ Ug + S @ Wg + bg)
        R = jnp.tanh(Xs @ Ur + S @ Wr + br)
        Hg = jnp.tanh(Xs @ Uh + (S * R) @ Wh + bh)
        S = (1.0 - G) * Hg + Z * S

    Wf = params["Wf_aug"][:H, :]
    bf = params["Wf_aug"][H:, :]
    result = S @ Wf + bf
    op = jnp.argmax(result, axis=1).reshape(-1, 1).astype(jnp.float32)
    return op, result


# --------------------------------- main ------------------------------------ #
if __name__ == "__main__":
    layer_width = 32
    n_layers = 2
    input_dim = 3      # spatial dim (time is added -> input_size = 4)
    num_classes = 4
    batch = 8

    key = jax.random.PRNGKey(0)
    kp, kt, kx = jax.random.split(key, 3)

    params = init_params(kp, layer_width, n_layers, input_dim, num_classes)
    t = jax.random.uniform(kt, (batch, 1), dtype=jnp.float32)
    x = jax.random.normal(kx, (batch, input_dim), dtype=jnp.float32)

    op, result = pianet_forward(t, x, params, n_layers=n_layers,
                                layer_width=layer_width)
    op, result = jax.block_until_ready((op, result))

    op_ref, result_ref = pianet_ref(t, x, params, n_layers=n_layers,
                                    layer_width=layer_width)
    assert result.shape == (batch, num_classes) and op.shape == (batch, 1)
    assert jnp.allclose(result, result_ref, atol=1e-5, rtol=1e-5)
    assert jnp.allclose(op, op_ref)

    print("KERNEL_OK")
</pallas_src>

<mosaic_0001>
module attributes {stable_mosaic.version = 11 : i64} {
  func.func @pianet_kernel(%arg0: memref<8x1xf32, #tpu.memory_space<vmem>>, %arg1: memref<8x3xf32, #tpu.memory_space<vmem>>, %arg2: memref<5x288xf32, #tpu.memory_space<vmem>>, %arg3: memref<2x32x128xf32, #tpu.memory_space<vmem>>, %arg4: memref<33x4xf32, #tpu.memory_space<vmem>>, %arg5: memref<8x5xf32, #tpu.memory_space<vmem>>, %arg6: memref<8x5xf32, #tpu.memory_space<vmem>>) attributes {dimension_semantics = [], scalar_prefetch = 0 : i64, scratch_operands = 1 : i64, tpu.core_type = #tpu.core_type<tc>} {
    %c0 = arith.constant 0 : index
    %c0_0 = arith.constant 0 : index
    %0 = vector.load %arg0[%c0, %c0_0] : memref<8x1xf32, #tpu.memory_space<vmem>>, vector<8x1xf32>
    %c0_1 = arith.constant 0 : index
    %c0_2 = arith.constant 0 : index
    %1 = vector.load %arg6[%c0_1, %c0_2] : memref<8x5xf32, #tpu.memory_space<vmem>>, vector<8x1xf32>
    tpu.vector_store %arg6[%c0_1, %c0_2], %0 {strides = array<i32>} : memref<8x5xf32, #tpu.memory_space<vmem>>, vector<8x1xf32>,
    %c0_3 = arith.constant 0 : index
    %c0_4 = arith.constant 0 : index
    %2 = vector.load %arg1[%c0_3, %c0_4] : memref<8x3xf32, #tpu.memory_space<vmem>>, vector<8x3xf32>
    %c0_5 = arith.constant 0 : index
    %c1 = arith.constant 1 : index
    %3 = vector.load %arg6[%c0_5, %c1] : memref<8x5xf32, #tpu.memory_space<vmem>>, vector<8x3xf32>
    tpu.vector_store %arg6[%c0_5, %c1], %2 {strides = array<i32>} : memref<8x5xf32, #tpu.memory_space<vmem>>, vector<8x3xf32>,
    %c0_6 = arith.constant 0 : index
    %c0_7 = arith.constant 0 : index
    %4 = vector.load %arg6[%c0_6, %c0_7] : memref<8x5xf32, #tpu.memory_space<vmem>>, vector<8x4xf32>
    %cst = arith.constant dense<0x7F800000> : vector<4xf32>
    %5 = vector.multi_reduction <minimumf>, %4, %cst [0] : vector<8x4xf32> to vector<4xf32>
    %6 = vector.shape_cast %5 : vector<4xf32> to vector<1x4xf32>
    %cst_8 = arith.constant dense<0xFF800000> : vector<4xf32>
    %7 = vector.multi_reduction <maximumf>, %4, %cst_8 [0] : vector<8x4xf32> to vector<4xf32>
    %8 = vector.shape_cast %7 : vector<4xf32> to vector<1x4xf32>
    %9 = arith.subf %8, %6 : vector<1x4xf32>
    %cst_9 = arith.constant 0.000000e+00 : f32
    %10 = vector.broadcast %cst_9 : f32 to vector<1x4xf32>
    %11 = arith.cmpf oeq, %9, %10 : vector<1x4xf32>
    %cst_10 = arith.constant 1.000000e+00 : f32
    %12 = vector.broadcast %cst_10 : f32 to vector<1x4xf32>
    %13 = arith.select %11, %12, %9 : vector<1x4xi1>, vector<1x4xf32>
    %14 = tpu.reciprocal %13 : vector<1x4xf32> -> vector<1x4xf32>
    %15 = vector.broadcast %6 : vector<1x4xf32> to vector<8x4xf32>
    %16 = arith.subf %4, %15 : vector<8x4xf32>
    %17 = vector.broadcast %14 : vector<1x4xf32> to vector<8x4xf32>
    %18 = arith.mulf %16, %17 : vector<8x4xf32>
    %c0_11 = arith.constant 0 : index
    %c0_12 = arith.constant 0 : index
    %19 = vector.load %arg6[%c0_11, %c0_12] : memref<8x5xf32, #tpu.memory_space<vmem>>, vector<8x4xf32>
    tpu.vector_store %arg6[%c0_11, %c0_12], %18 {strides = array<i32>} : memref<8x5xf32, #tpu.memory_space<vmem>>, vector<8x4xf32>,
    %cst_13 = arith.constant 1.000000e+00 : f32
    %20 = vector.broadcast %cst_13 : f32 to vector<8x1xf32>
    %c0_14 = arith.constant 0 : index
    %c4 = arith.constant 4 : index
    %21 = vector.load %arg6[%c0_14, %c4] : memref<8x5xf32, #tpu.memory_space<vmem>>, vector<8x1xf32>
    tpu.vector_store %arg6[%c0_14, %c4], %20 {strides = array<i32>} : memref<8x5xf32, #tpu.memory_space<vmem>>, vector<8x1xf32>,
    %c0_15 = arith.constant 0 : index
    %c0_16 = arith.constant 0 : index
    %22 = vector.load %arg6[%c0_15, %c0_16] : memref<8x5xf32, #tpu.memory_space<vmem>>, vector<8x5xf32>
    %c0_17 = arith.constant 0 : index
    %c0_18 = arith.constant 0 : index
    %23 = vector.load %arg2[%c0_17, %c0_18] : memref<5x288xf32, #tpu.memory_space<vmem>>, vector<5x288xf32>
    %cst_19 = arith.constant dense<0.000000e+00> : vector<8x288xf32>
    %24 = tpu.matmul %22, %23, %cst_19 {dimension_numbers = #tpu.dot_dimension_numbers<[1], [0], [0], [1], [0, 0, 1, 1], [], []>} : vector<8x5xf32>, vector<5x288xf32>, vector<8x288xf32> -> vector<8x288xf32>
    %25 = vector.extract_strided_slice %24 {offsets = [0, 256], sizes = [8, 32], strides = [1, 1]} : vector<8x288xf32> to vector<8x32xf32>
    %26 = math.tanh %25 : vector<8x32xf32>
    %27 = vector.extract_strided_slice %24 {offsets = [0, 0], sizes = [8, 128], strides = [1, 1]} : vector<8x288xf32> to vector<8x128xf32>
    %c0_20 = arith.constant 0 : index
    %c0_21 = arith.constant 0 : index
    %c0_22 = arith.constant 0 : index
    %28 = vector.load %arg3[%c0_20, %c0_21, %c0_22] : memref<2x32x128xf32, #tpu.memory_space<vmem>>, vector<1x32x128xf32>
    %29 = vector.shape_cast %28 : vector<1x32x128xf32> to vector<32x128xf32>
    %cst_23 = arith.constant dense<0.000000e+00> : vector<8x128xf32>
    %30 = tpu.matmul %26, %29, %cst_23 {dimension_numbers = #tpu.dot_dimension_numbers<[1], [0], [0], [1], [0, 0, 1, 1], [], []>} : vector<8x32xf32>, vector<32x128xf32>, vector<8x128xf32> -> vector<8x128xf32>
    %31 = arith.addf %30, %27 : vector<8x128xf32>
    %32 = math.tanh %31 : vector<8x128xf32>
    %33 = vector.extract_strided_slice %32 {offsets = [0, 32], sizes = [8, 32], strides = [1, 1]} : vector<8x128xf32> to vector<8x32xf32>
    %34 = vector.extract_strided_slice %32 {offsets = [0, 64], sizes = [8, 32], strides = [1, 1]} : vector<8x128xf32> to vector<8x32xf32>
    %35 = vector.extract_strided_slice %32 {offsets = [0, 96], sizes = [8, 32], strides = [1, 1]} : vector<8x128xf32> to vector<8x32xf32>
    %36 = arith.mulf %26, %35 : vector<8x32xf32>
    %37 = vector.extract_strided_slice %29 {offsets = [0, 0], sizes = [32, 32], strides = [1, 1]} : vector<32x128xf32> to vector<32x32xf32>
    %cst_24 = arith.constant dense<0.000000e+00> : vector<8x32xf32>
    %38 = tpu.matmul %36, %37, %cst_24 {dimension_numbers = #tpu.dot_dimension_numbers<[1], [0], [0], [1], [0, 0, 1, 1], [], []>} : vector<8x32xf32>, vector<32x32xf32>, vector<8x32xf32> -> vector<8x32xf32>
    %39 = vector.extract_strided_slice %27 {offsets = [0, 0], sizes = [8, 32], strides = [1, 1]} : vector<8x128xf32> to vector<8x32xf32>
    %40 = arith.addf %38, %39 : vector<8x32xf32>
    %41 = math.tanh %40 : vector<8x32xf32>
    %cst_25 = arith.constant 1.000000e+00 : f32
    %42 = vector.broadcast %cst_25 : f32 to vector<8x32xf32>
    %43 = arith.subf %42, %34 : vector<8x32xf32>
    %44 = arith.mulf %43, %41 : vector<8x32xf32>
    %45 = arith.mulf %33, %26 : vector<8x32xf32>
    %46 = arith.addf %44, %45 : vector<8x32xf32>
    %47 = vector.extract_strided_slice %24 {offsets = [0, 128], sizes = [8, 128], strides = [1, 1]} : vector<8x288xf32> to vector<8x128xf32>
    %c1_26 = arith.constant 1 : index
    %c0_27 = arith.constant 0 : index
    %c0_28 = arith.constant 0 : index
    %48 = vector.load %arg3[%c1_26, %c0_27, %c0_28] : memref<2x32x128xf32, #tpu.memory_space<vmem>>, vector<1x32x128xf32>
    %49 = vector.shape_cast %48 : vector<1x32x128xf32> to vector<32x128xf32>
    %cst_29 = arith.constant dense<0.000000e+00> : vector<8x128xf32>
    %50 = tpu.matmul %46, %49, %cst_29 {dimension_numbers = #tpu.dot_dimension_numbers<[1], [0], [0], [1], [0, 0, 1, 1], [], []>} : vector<8x32xf32>, vector<32x128xf32>, vector<8x128xf32> -> vector<8x128xf32>
    %51 = arith.addf %50, %47 : vector<8x128xf32>
    %52 = math.tanh %51 : vector<8x128xf32>
    %53 = vector.extract_strided_slice %52 {offsets = [0, 32], sizes = [8, 32], strides = [1, 1]} : vector<8x128xf32> to vector<8x32xf32>
    %54 = vector.extract_strided_slice %52 {offsets = [0, 64], sizes = [8, 32], strides = [1, 1]} : vector<8x128xf32> to vector<8x32xf32>
    %55 = vector.extract_strided_slice %52 {offsets = [0, 96], sizes = [8, 32], strides = [1, 1]} : vector<8x128xf32> to vector<8x32xf32>
    %56 = arith.mulf %46, %55 : vector<8x32xf32>
    %57 = vector.extract_strided_slice %49 {offsets = [0, 0], sizes = [32, 32], strides = [1, 1]} : vector<32x128xf32> to vector<32x32xf32>
    %cst_30 = arith.constant dense<0.000000e+00> : vector<8x32xf32>
    %58 = tpu.matmul %56, %57, %cst_30 {dimension_numbers = #tpu.dot_dimension_numbers<[1], [0], [0], [1], [0, 0, 1, 1], [], []>} : vector<8x32xf32>, vector<32x32xf32>, vector<8x32xf32> -> vector<8x32xf32>
    %59 = vector.extract_strided_slice %47 {offsets = [0, 0], sizes = [8, 32], strides = [1, 1]} : vector<8x128xf32> to vector<8x32xf32>
    %60 = arith.addf %58, %59 : vector<8x32xf32>
    %61 = math.tanh %60 : vector<8x32xf32>
    %cst_31 = arith.constant 1.000000e+00 : f32
    %62 = vector.broadcast %cst_31 : f32 to vector<8x32xf32>
    %63 = arith.subf %62, %54 : vector<8x32xf32>
    %64 = arith.mulf %63, %61 : vector<8x32xf32>
    %65 = arith.mulf %53, %46 : vector<8x32xf32>
    %66 = arith.addf %64, %65 : vector<8x32xf32>
    %c0_32 = arith.constant 0 : index
    %c0_33 = arith.constant 0 : index
    %67 = vector.load %arg4[%c0_32, %c0_33] : memref<33x4xf32, #tpu.memory_space<vmem>>, vector<33x4xf32>
    %68 = vector.extract_strided_slice %67 {offsets = [0, 0], sizes = [32, 4], strides = [1, 1]} : vector<33x4xf32> to vector<32x4xf32>
    %cst_34 = arith.constant dense<0.000000e+00> : vector<8x4xf32>
    %69 = tpu.matmul %66, %68, %cst_34 {dimension_numbers = #tpu.dot_dimension_numbers<[1], [0], [0], [1], [0, 0, 1, 1], [], []>} : vector<8x32xf32>, vector<32x4xf32>, vector<8x4xf32> -> vector<8x4xf32>
    %70 = vector.extract_strided_slice %67 {offsets = [32, 0], sizes = [1, 4], strides = [1, 1]} : vector<33x4xf32> to vector<1x4xf32>
    %71 = vector.broadcast %70 : vector<1x4xf32> to vector<8x4xf32>
    %72 = arith.addf %69, %71 : vector<8x4xf32>
    %c0_35 = arith.constant 0 : index
    %c0_36 = arith.constant 0 : index
    %73 = vector.load %arg5[%c0_35, %c0_36] : memref<8x5xf32, #tpu.memory_space<vmem>>, vector<8x4xf32>
    tpu.vector_store %arg5[%c0_35, %c0_36], %72 {strides = array<i32>} : memref<8x5xf32, #tpu.memory_space<vmem>>, vector<8x4xf32>,
    %74 = tpu.iota {dimensions = array<i32: 1>} : vector<8x4xi32>
    %cst_37 = arith.constant dense<0xFF800000> : vector<8xf32>
    %75 = vector.multi_reduction <maximumf>, %72, %cst_37 [1] : vector<8x4xf32> to vector<8xf32>
    %76 = vector.shape_cast %75 : vector<8xf32> to vector<8x1xf32>
    %77 = vector.broadcast %76 : vector<8x1xf32> to vector<8x4xf32>
    %78 = arith.cmpf oeq, %72, %77 : vector<8x4xf32>
    %c4_i32 = arith.constant 4 : i32
    %79 = vector.broadcast %c4_i32 : i32 to vector<8x4xi32>
    %80 = arith.select %78, %74, %79 : vector<8x4xi1>, vector<8x4xi32>
    %cst_38 = arith.constant dense<2147483647> : vector<8xi32>
    %81 = vector.multi_reduction <minsi>, %80, %cst_38 [1] : vector<8x4xi32> to vector<8xi32>
    %82 = vector.shape_cast %81 : vector<8xi32> to vector<8x1xi32>
    %83 = arith.sitofp %82 : vector<8x1xi32> to vector<8x1xf32>
    %c0_39 = arith.constant 0 : index
    %c4_40 = arith.constant 4 : index
    %84 = vector.load %arg5[%c0_39, %c4_40] : memref<8x5xf32, #tpu.memory_space<vmem>>, vector<8x1xf32>
    tpu.vector_store %arg5[%c0_39, %c4_40], %83 {strides = array<i32>} : memref<8x5xf32, #tpu.memory_space<vmem>>, vector<8x1xf32>,
    return
  }
}

</mosaic_0001>

<bundles_post_ra>
// kernel: tpu_custom_call.1
= control target key start
LH: loop header
LB: loop body
LE: loop exit
PB: predicated region body
PF: predicated region fallthrough
CT: control target
= control target key end

     0   :  { %10 = vsyncpa [#allocation4], 0  ;;  %s1022_s0 = inlined_call_operand.vmem [shape: f32[8,1], index: 0, kind: input, shape index: {}]   ;;  %s1023_s1 = inlined_call_operand.vmem [shape: f32[8,3], index: 1, kind: input, shape index: {}]   ;;  %s1024_s2 = inlined_call_operand.hbm [shape: f32[5,288], index: 2, kind: input, shape index: {}]   ;;  %s1025_s3 = inlined_call_operand.vmem [shape: f32[2,32,128], index: 3, kind: input, shape index: {}]   ;;  %s1026_s4 = inlined_call_operand.vmem [shape: f32[33,4], index: 4, kind: input, shape index: {}]   ;;  %s1027_s5 = inlined_call_operand.hbm [shape: f32[8,5], index: 5, kind: output, shape index: {}]  }
   0x1   :  { %11 = vsyncpa [#allocation5], 0  ;;  %s869_s18 = smov [#allocation3]  }
   0x2   :  { %s22_s19 = sshll.u32 %s869_s18, 4  ;;  %s23_s19 = int_to_ptr.vmem [resolvable:$true] %s22_s19 }
   0x3   :  { %s833_s20 = scalar_lea.vmem %s23_s19, 384  ;;  %p838_p1 = scmp.lt.s32.totalorder %s23_s19, %s23_s19 }
   0x4   :  { %p834_p0 = scmp.ne.s32.totalorder %s23_s19, %s833_s20  ;;  %p839_p2 = scmp.lt.s32.totalorder %s833_s20, %s833_s20 }
   0x6   :  { %p840_p3 = por %p839_p2, %p838_p1 }
   0x8   :  { %p841_p4 = pnand %p840_p3, %p834_p0 }
   0xa   :  { %844 = shalt.err (!%p841_p4)
}
   0xb   :  { %25 = dma.hbm_to_vmem [thread:$0]  %s1024_s2, 384, %s23_s19, [#allocation4]  }
   0xc   :  { %865 = dma.done.wait [#allocation4], 384  }
   0xd   :  { %866 = vsyncadd [#allocation4], 4294966912  ;;  %vm34_vm0 = vcmask 7168   ;;  %v36_v0 = vld [vmem:[%s1023_s1] sm:$0xff]  ;;  %s870_s27 = smov 1   ;;  %vm76_vm1 = vcmask 1044480  }
   0xe   :  { %v33_v1 = vld [vmem:[%s1022_s0] sm:$0xff]  ;;  %38 = vrot.lane.b32.xlu0 %v36_v0, %s870_s27  ;;  %v70_v2 = vld [vmem:[#allocation3 + $0x8] sm:$0x1f]  ;;  %v69_v3 = vld [vmem:[#allocation3] sm:$0x1f]  ;;  %v871_v4 = vmov 0.0  }
   0xf   :  { %35 = vst.msk [vmem:[#allocation2] sm:$0xff] %vm34_vm0, %v33_v1  ;;  %702 = vmatprep.subr.msk.mxu1 %vm76_vm1, %v70_v2  ;;  %150 = vmatprep.mubr.f32.mxu1 %v871_v4  ;;  %vm872_vm2 = vmmov 0   ;;  %vm41_vm3 = vcmask 31752   ;;  %vm44_vm4 = vcmask 31744   ;;  %vm66_vm6 = vcmask 39968   ;;  %v231_v29 = vld [vmem:[%s1025_s3 + $0x18] sm:$0xff] }
  0x10   :  { %703 = vmatpush1.msk.msra.mxu1 %vm76_vm1, %v69_v3  ;;  %749 = vmatprep.subr.mxu0 %v871_v4  ;;  %v873_v26 = vmov 1.0   ;;  %vm72_vm7 = vcmask 39936   ;;  %v71_v27 = vld [vmem:[#allocation3 + $0x10] sm:$0x1f]  ;;  %v230_v30 = vld [vmem:[%s1025_s3 + $0x10] sm:$0xff]  ;;  %v229_v31 = vld [vmem:[%s1025_s3 + $0x8] sm:$0xff] }
  0x11   :  { %744 = vmatprep.subr.mxu1 %v871_v4  ;;  %757 = vmatprep.mubr.msk.f32.mxu0 %vm872_vm2, %v871_v4  ;;  %v228_v32 = vld [vmem:[%s1025_s3] sm:$0xff]  ;;  %vm232_vm8 = vcmask 261120   ;;  %s874_s8 = smov 32   ;;  %v712_v49 = vld [vmem:[%s1025_s3 + $0x38] sm:$0xff]  ;;  %v711_v50 = vld [vmem:[%s1025_s3 + $0x30] sm:$0xff]  ;;  %s875_s17 = smov 64  }
  0x12   :  { %750 = vmatpush3.msra.mxu0 %v231_v29  ;;  %v710_v51 = vld [vmem:[%s1025_s3 + $0x28] sm:$0xff]  ;;  %v709_v52 = vld [vmem:[%s1025_s3 + $0x20] sm:$0xff]  ;;  %s876_s3 = smov 96  }
  0x13   :  { %751 = vmatprep.subr.mxu0 %v871_v4 }
  0x14   :  { %752 = vmatpush3.msra.mxu0 %v230_v30 }
  0x15   :  { %753 = vmatprep.subr.mxu0 %v871_v4 }
  0x16   :  { %754 = vmatpush3.msra.mxu0 %v229_v31 }
  0x17   :  { %755 = vmatprep.subr.mxu0 %v871_v4 }
  0x18   :  { %756 = vmatpush3.msra.mxu0 %v228_v32 }
  0x19   :  { %771 = vmatprep.subr.mxu0 %v871_v4 }
  0x80   :  { %v39_v5 = vpop.permute.xlu0 %38 }
  0x81   :  { %42 = vst.msk [vmem:[#allocation2] sm:$0xff] %vm41_vm3, %v39_v5 }
  0x88   :  { %v43_v6 = vld [vmem:[#allocation2] sm:$0xff] }
  0x89   :  { %v45_v7 = vsel %vm44_vm4, %v43_v6, inf  ;;  %v52_v8 = vsel %vm44_vm4, %v43_v6, -inf }
  0x8a   :  { %v46_v9 = vrot.slane %v45_v7, 4  ;;  %v53_v10 = vrot.slane %v52_v8, 4 }
  0x8c   :  { %v47_v11 = vmin.f32 %v45_v7, %v46_v9  ;;  %v54_v12 = vmax.f32 %v52_v8, %v53_v10  ;;  %v581_v9 = vld [vmem:[%s1026_s4 + $0x18] sm:$0xff]  ;;  %v580_v10 = vld [vmem:[%s1026_s4 + $0x10] sm:$0xff] }
  0x8e   :  { %v48_v13 = vrot.slane %v47_v11, 2  ;;  %v55_v14 = vrot.slane %v54_v12, 2 }
  0x90   :  { %v49_v15 = vmin.f32 %v47_v11, %v48_v13  ;;  %v56_v16 = vmax.f32 %v54_v12, %v55_v14  ;;  %v579_v11 = vld [vmem:[%s1026_s4 + $0x8] sm:$0xff]  ;;  %v578_v12 = vld [vmem:[%s1026_s4] sm:$0xff] }
  0x92   :  { %v50_v17 = vrot.slane %v49_v15, 1  ;;  %v57_v18 = vrot.slane %v56_v16, 1 }
  0x94   :  { %v51_v19 = vmin.f32 %v49_v15, %v50_v17  ;;  %v58_v20 = vmax.f32 %v56_v16, %v57_v18 }
  0x96   :  { %v59_v21 = vsub.f32 %v58_v20, %v51_v19  ;;  %v63_v23 = vsub.f32 %v43_v6, %v51_v19  ;;  %v715_v20 = vld [vmem:[%s1026_s4 + $0x20] ss:$0 sm:$0xff]  ;;  %s877_s4 = smov [#allocation6]  }
  0x97   :  { %s693_s0 = sshll.u32 %s877_s4, 4  ;;  %s694_s0 = int_to_ptr.vmem [resolvable:$true] %s693_s0 }
  0x98   :  { %vm60_vm5 = vcmp.eq.f32.partialorder %v59_v21, 0.0  ;;  %s845_s1 = scalar_lea.vmem %s694_s0, 128  ;;  %p850_p6 = scmp.lt.s32.totalorder %s694_s0, %s694_s0 }
  0x99   :  { %v61_v22 = vsel %vm60_vm5, 1.0, %v59_v21  ;;  %p846_p5 = scmp.ne.s32.totalorder %s694_s0, %s845_s1  ;;  %p851_p7 = scmp.lt.s32.totalorder %s845_s1, %s845_s1 }
  0x9a   :  { %813 = vrcp.f32 %v61_v22 }
  0x9b   :  { %p852_p8 = por %p851_p7, %p850_p6 }
  0x9d   :  { %p853_p9 = pnand %p852_p8, %p846_p5 }
  0xa7   :  { %v814_v24 = vpop.eup %813 }
  0xa8   :  { %v64_v25 = vmul.f32 %v814_v24, %v63_v23  ;;  %v663_v24 = vlaneseq }
  0xaa   :  { %65 = vst.msk [vmem:[#allocation2] sm:$0xff] %vm44_vm4, %v64_v25  ;;  %v664_v25 = vand.u32 127, %v663_v24 }
  0xab   :  { %67 = vst.msk [vmem:[#allocation2] sm:$0xff] %vm66_vm6, %v873_v26 }
  0xb2   :  { %v68_v28 = vld [vmem:[#allocation2] sm:$0xff] }
  0xb3   :  { %704 = vmatmul.mubr.msk.f32.vlgmr.msra.gmra.mxu1 %vm72_vm7, %v68_v28 }
  0xb4   :  { %745 = vmatpush3.msk.msra.mxu1 %vm76_vm1, %v71_v27  ;;  %746 = vmatprep.mubr.msk.f32.mxu1 %vm872_vm2, %v871_v4 }
  0xb5   :  { %760 = vmatprep.subr.mxu1 %v871_v4 }
  0xb7   :  { %747 = vmatmul.mubr.msk.f32.vlgmr.msra.gmra.mxu1 %vm72_vm7, %v68_v28 }
  0xb8   :  { %768 = vmatprep.mubr.msk.f32.mxu1 %vm872_vm2, %v871_v4  ;;  %761 = vmatpush3.msra.mxu1 %v231_v29 }
  0xb9   :  { %762 = vmatprep.subr.mxu1 %v871_v4 }
  0xba   :  { %763 = vmatpush3.msra.mxu1 %v230_v30 }
  0xbb   :  { %764 = vmatprep.subr.mxu1 %v871_v4 }
  0xbc   :  { %765 = vmatpush3.msra.mxu1 %v229_v31 }
  0xbd   :  { %766 = vmatprep.subr.mxu1 %v871_v4 }
  0xbe   :  { %767 = vmatpush3.msra.mxu1 %v228_v32 }
  0xbf   :  { %782 = vmatprep.subr.mxu1 %v871_v4 }
 0x173   :  { %v152_v33 = vpop.f32.mrf.mxu1 }
 0x175   :  { %v954_v34 = vpop.f32.mrf.mxu1 }
 0x177   :  { %v223_v35 = vpop.f32.mrf.mxu1 }
 0x178   :  { %815 = vtanh.f32 %v223_v35 }
 0x179   :  { %v748_v36 = vpop.f32.mrf.mxu1 }
 0x185   :  { %v816_v37 = vpop.eup %815 }
 0x186   :  { %392 = vrot.lane.b32.xlu1 %v816_v37, %s874_s8  ;;  %758 = vmatmul.mubr.msk.f32.vlgmr.msra.gmra.mxu0 %vm232_vm8, %v816_v37 }
 0x187   :  { %779 = vmatprep.mubr.msk.f32.mxu0 %vm872_vm2, %v871_v4  ;;  %772 = vmatpush3.msra.mxu0 %v712_v49 }
 0x188   :  { %773 = vmatprep.subr.mxu0 %v871_v4 }
 0x189   :  { %774 = vmatpush3.msra.mxu0 %v711_v50 }
 0x18a   :  { %775 = vmatprep.subr.mxu0 %v871_v4 }
 0x18b   :  { %776 = vmatpush3.msra.mxu0 %v710_v51 }
 0x18c   :  { %777 = vmatprep.subr.mxu0 %v871_v4 }
 0x18d   :  { %778 = vmatpush3.msra.mxu0 %v709_v52 }
 0x18e   :  { %793 = vmatprep.subr.mxu0 %v871_v4 }
 0x1f8   :  { %v393_v42 = vpop.permute.xlu1 %392 }
 0x246   :  { %v302_v38 = vpop.f32.mrf.mxu0 }
 0x247   :  { %v303_v39 = vadd.f32 %v302_v38, %v152_v33 }
 0x248   :  { %v759_v40 = vpop.f32.mrf.mxu0 }
 0x249   :  { %817 = vtanh.f32 %v303_v39 }
 0x256   :  { %v818_v41 = vpop.eup %817 }
 0x257   :  { %308 = vrot.lane.b32.xlu0 %v818_v41, %s874_s8  ;;  %v395_v43 = vmul.f32 %v818_v41, %v393_v42  ;;  %v386_v54 = vsub.f32 1.0, %v818_v41 }
 0x25b   :  { %397 = vrot.lane.b32.xlu0 %v395_v43, %s874_s8 }
 0x2c9   :  { %v309_v44 = vpop.permute.xlu0 %308 }
 0x2ca   :  { %v311_v45 = vmul.f32 %v816_v37, %v309_v44 }
 0x2cc   :  { %769 = vmatmul.mubr.msk.f32.vlgmr.msra.gmra.mxu1 %vm232_vm8, %v311_v45 }
 0x2cd   :  { %790 = vmatprep.mubr.msk.f32.mxu1 %vm872_vm2, %v871_v4  ;;  %783 = vmatpush3.msra.mxu1 %v712_v49  ;;  %v398_v57 = vpop.permute.xlu0 %397 }
 0x2ce   :  { %784 = vmatprep.subr.mxu1 %v871_v4 }
 0x2cf   :  { %785 = vmatpush3.msra.mxu1 %v711_v50 }
 0x2d0   :  { %786 = vmatprep.subr.mxu1 %v871_v4 }
 0x2d1   :  { %787 = vmatpush3.msra.mxu1 %v710_v51 }
 0x2d2   :  { %788 = vmatprep.subr.mxu1 %v871_v4 }
 0x2d3   :  { %789 = vmatpush3.msra.mxu1 %v709_v52 }
 0x38c   :  { %v381_v46 = vpop.f32.mrf.mxu1 }
 0x38d   :  { %v382_v47 = vadd.f32 %v381_v46, %v152_v33 }
 0x38e   :  { %v770_v48 = vpop.f32.mrf.mxu1 }
 0x38f   :  { %819 = vtanh.f32 %v382_v47 }
 0x39c   :  { %v820_v53 = vpop.eup %819 }
 0x39d   :  { %388 = vrot.lane.b32.xlu1 %v820_v53, %s875_s17 }
 0x40f   :  { %v389_v55 = vpop.permute.xlu1 %388 }
 0x410   :  { %v391_v56 = vmul.f32 %v389_v55, %v386_v54 }
 0x412   :  { %v400_v58 = vadd.f32 %v398_v57, %v391_v56 }
 0x414   :  { %407 = vrot.lane.b32.xlu1 %v400_v58, %s875_s17 }
 0x486   :  { %v408_v59 = vpop.permute.xlu1 %407 }
 0x487   :  { %780 = vmatmul.mubr.msk.f32.vlgmr.msra.gmra.mxu0 %vm232_vm8, %v408_v59 }
 0x488   :  { %801 = vmatprep.mubr.msk.f32.mxu0 %vm872_vm2, %v871_v4  ;;  %794 = vmatpush3.msra.mxu0 %v581_v9 }
 0x489   :  { %795 = vmatprep.subr.mxu0 %v871_v4 }
 0x48a   :  { %796 = vmatpush3.msra.mxu0 %v580_v10 }
 0x48b   :  { %797 = vmatprep.subr.mxu0 %v871_v4 }
 0x48c   :  { %798 = vmatpush3.msra.mxu0 %v579_v11 }
 0x48d   :  { %799 = vmatprep.subr.mxu0 %v871_v4 }
 0x48e   :  { %800 = vmatpush3.msra.mxu0 %v578_v12 }
 0x547   :  { %v477_v60 = vpop.f32.mrf.mxu0 }
 0x548   :  { %v478_v61 = vadd.f32 %v477_v60, %v954_v34 }
 0x549   :  { %v781_v62 = vpop.f32.mrf.mxu0 }
 0x54a   :  { %821 = vtanh.f32 %v478_v61 }
 0x557   :  { %v822_v63 = vpop.eup %821 }
 0x558   :  { %483 = vrot.lane.b32.xlu0 %v822_v63, %s876_s3  ;;  %v563_v14 = vsub.f32 1.0, %v822_v63 }
 0x55c   :  { %569 = vrot.lane.b32.xlu0 %v400_v58, %s876_s3 }
 0x5ca   :  { %v484_v0 = vpop.permute.xlu0 %483 }
 0x5cb   :  { %v486_v1 = vmul.f32 %v484_v0, %v400_v58 }
 0x5cd   :  { %488 = vrot.lane.b32.xlu1 %v486_v1, %s875_s17 }
 0x5ce   :  { %v570_v2 = vpop.permute.xlu0 %569 }
 0x5cf   :  { %v572_v3 = vmul.f32 %v822_v63, %v570_v2 }
 0x5d1   :  { %574 = vrot.lane.b32.xlu0 %v572_v3, %s874_s8 }
 0x63f   :  { %v489_v5 = vpop.permute.xlu1 %488 }
 0x640   :  { %791 = vmatmul.mubr.msk.f32.vlgmr.msra.gmra.mxu1 %vm232_vm8, %v489_v5 }
 0x643   :  { %v575_v17 = vpop.permute.xlu0 %574 }
 0x700   :  { %v558_v6 = vpop.f32.mrf.mxu1 }
 0x701   :  { %v559_v7 = vadd.f32 %v558_v6, %v954_v34 }
 0x702   :  { %v792_v8 = vpop.f32.mrf.mxu1 }
 0x703   :  { %823 = vtanh.f32 %v559_v7 }
 0x710   :  { %v824_v13 = vpop.eup %823 }
 0x711   :  { %565 = vrot.lane.b32.xlu1 %v824_v13, %s875_s17 }
 0x783   :  { %v566_v15 = vpop.permute.xlu1 %565 }
 0x784   :  { %v568_v16 = vmul.f32 %v566_v15, %v563_v14 }
 0x786   :  { %v577_v18 = vadd.f32 %v575_v17, %v568_v16 }
 0x788   :  { %588 = vrot.lane.b32.xlu1 %v577_v18, %s875_s17 }
 0x7fa   :  { %v589_v19 = vpop.permute.xlu1 %588 }
 0x7fb   :  { %802 = vmatmul.mubr.msk.f32.vlgmr.msra.gmra.mxu0 %vm232_vm8, %v589_v19 }
 0x8bb   :  { %v658_v21 = vpop.f32.mrf.mxu0 }
 0x8bc   :  { %v659_v4 = vadd.f32 %v715_v20, %v658_v21 }
 0x8bd   :  { %v803_v22 = vpop.f32.mrf.mxu0 }
 0x8be   :  { %662 = vst.msk [vmem:[#allocation6] sm:$0xff] %vm44_vm4, %v659_v4  ;;  %v665_v23 = vsel %vm44_vm4, %v659_v4, -inf }
 0x8bf   :  { %666 = vmax.xlane.f32.xlu0 %v665_v23 }
 0x948   :  { %v667_v26 = vpop.xlane.xlu0 %666 }
 0x949   :  { %vm668_vm9 = vcmp.eq.f32.partialorder %v659_v4, %v667_v26 }
 0x94a   :  { %v669_v27 = vsel %vm668_vm9, %v664_v25, 4 }
 0x94b   :  { %v670_v28 = vsel %vm44_vm4, %v669_v27, 2147483647 }
 0x94c   :  { %v672_v29 = vshra.s32 %v670_v28, 16  ;;  %v671_v31 = vand.u32 65535, %v670_v28 }
 0x94e   :  { %v674_v30 = vcvt.s32.f32 %v672_v29  ;;  %v673_v33 = vcvt.s32.f32 %v671_v31 }
 0x950   :  { %675 = vmin.xlane.f32.xlu1 %v674_v30 }
 0x9d9   :  { %v676_v32 = vpop.xlane.xlu1 %675 }
 0x9da   :  { %vm677_vm10 = vcmp.eq.f32.partialorder %v674_v30, %v676_v32  ;;  %v682_v35 = vcvt.f32.s32 %v676_v32 }
 0x9db   :  { %v678_v34 = vsel %vm677_vm10, %v673_v33, inf }
 0x9dc   :  { %679 = vmin.xlane.f32.xlu0 %v678_v34  ;;  %v683_v37 = vshll.u32 %v682_v35, 16 }
 0xa65   :  { %v680_v36 = vpop.xlane.xlu0 %679 }
 0xa66   :  { %v681_v38 = vcvt.f32.s32 %v680_v36 }
 0xa68   :  { %v684_v39 = vadd.s32 %v683_v37, %v681_v38 }
 0xa6a   :  { %v685_v40 = vcvt.s32.f32 %v684_v39 }
 0xa6c   :  { %686 = vst.msk [vmem:[#allocation6] sm:$0xff] %vm66_vm6, %v685_v40 }
 0xa6d   :  { %856 = shalt.err (!%p853_p9)
}
 0xa6e   :  { %696 = dma.vmem_to_hbm [thread:$0]  %s694_s0, 128, %s1027_s5, [#allocation5]  }
 0xa6f   :  { %867 = dma.done.wait [#allocation5], 128  }
 0xa70   :  { %868 = vsyncadd [#allocation5], 4294967168 }
 0xa71   :  { %700 = vsyncpa [#allocation4], 1 }
 0xa72   :  { %701 = vsyncpa [#allocation5], 1 }

</bundles_post_ra>
